<compile_context>
chip_gen: v5e
topology: v5e:2x2
jax: 0.10.0
libtpu: 0.0.40
codegen_flags: <defaults>
</compile_context>

<pallas_src>
from functools import partial

import jax
import jax.numpy as jnp
from jax.experimental import pallas as pl
from jax.experimental.pallas import tpu as pltpu


_VMEM_LIMIT_BYTES = 32 * 1024 * 1024        # streaming passes
_FUSED_VMEM_LIMIT_BYTES = 40 * 1024 * 1024  # fused path; < v7x's 64 MiB physical
_FUSED_BUDGET_BYTES = 20 * 1024 * 1024      # trigger for the VMEM-resident path
_MAX_TILE_BYTES = 4 * 1024 * 1024           # per streamed x tile
_TARGET_TILE_BYTES = 1 * 1024 * 1024        # grow batch block roughly to this
_MAX_LANE_TILE = 8192                       # lanes per tile cap


def _round_up(x, m):
    return ((x + m - 1) // m) * m


def _largest_divisor_leq(n, cap):
    cap = max(1, min(n, cap))
    for d in range(cap, 0, -1):
        if n % d == 0:
            return d
    return 1


def _largest_mult8_divisor_leq(n, cap):
    cap = min(n, cap)
    start = cap - cap % 8
    for d in range(start, 0, -8):
        if n % d == 0:
            return d
    return None


# --------------------------------------------------------------------------
# Kernels
# --------------------------------------------------------------------------
def _fused_kernel(x_ref, gamma_ref, beta_ref, o_ref, *, inv_count, eps):
    """Whole activation resident in VMEM: stats + normalize, one HBM read."""
    x = x_ref[...].astype(jnp.float32)                       # (N, 2C, HW)
    s = jnp.sum(jnp.sum(x, axis=0), axis=1, keepdims=True)   # (2C, 1)
    ss = jnp.sum(jnp.sum(x * x, axis=0), axis=1, keepdims=True)
    mean = s * inv_count
    var = jnp.maximum(ss * inv_count - mean * mean, 0.0)
    scale = gamma_ref[...] * jax.lax.rsqrt(var + eps)         # (2C, 1)
    shift = beta_ref[...] - mean * scale
    o_ref[...] = (x * scale + shift).astype(o_ref.dtype)


def _stats3d_kernel(x_ref, psum_ref, pssq_ref, *, hw, lane_tile, need_mask):
    """Per-(part,channel) sum / sum-of-squares into shard-local resident
    output blocks.  grid = (shard, batch_block, lane_tile)."""
    n = pl.program_id(1)
    t = pl.program_id(2)

    @pl.when((n == 0) & (t == 0))
    def _init():
        psum_ref[...] = jnp.zeros_like(psum_ref)
        pssq_ref[...] = jnp.zeros_like(pssq_ref)

    x = x_ref[...].astype(jnp.float32)                        # (Nb, 2C, L)

    def _accumulate(xv):
        psum_ref[...] += jnp.sum(jnp.sum(xv, axis=0), axis=1, keepdims=True)[None]
        pssq_ref[...] += jnp.sum(jnp.sum(xv * xv, axis=0), axis=1, keepdims=True)[None]

    if need_mask:
        last = pl.num_programs(2) - 1

        @pl.when(t == last)                                   # masked tail tile only
        def _masked():
            lane = jax.lax.broadcasted_iota(jnp.int32, x.shape, 2) + t * lane_tile
            _accumulate(jnp.where(lane < hw, x, 0.0))

        @pl.when(t != last)
        def _unmasked():
            _accumulate(x)
    else:
        _accumulate(x)


def _stats2d_kernel(x_ref, psum_ref, pssq_ref):
    """Lane-dense per-lane accumulation over the batch axis (hw < 128 path).
    grid = (lane_tile, batch_block), batch axis innermost."""
    @pl.when(pl.program_id(1) == 0)
    def _init():
        psum_ref[...] = jnp.zeros_like(psum_ref)
        pssq_ref[...] = jnp.zeros_like(pssq_ref)

    x = x_ref[...].astype(jnp.float32)                        # (Nb, L)
    psum_ref[...] += jnp.sum(x, axis=0, keepdims=True)
    pssq_ref[...] += jnp.sum(x * x, axis=0, keepdims=True)


def _normalize_kernel(scale_ref, shift_ref, x_ref, o_ref):
    """y = x * scale + shift; scale/shift broadcast over the x block."""
    x = x_ref[...].astype(jnp.float32)
    o_ref[...] = (x * scale_ref[...] + shift_ref[...]).astype(o_ref.dtype)


def _finalize_scale_shift(s, ss, gamma, beta, count, eps):
    # NOTE: E[x^2]-mean^2 in f32; clamped at 0.  Matches training-mode BN to
    # ~1e-4 for standardized activations (see review's precision note).
    mean = s / count
    var = jnp.maximum(ss / count - mean * mean, 0.0)
    scale = gamma * jax.lax.rsqrt(var + eps)
    shift = beta - mean * scale
    return scale, shift


# --------------------------------------------------------------------------
# Wrapper
# --------------------------------------------------------------------------
@partial(jax.jit, static_argnames=("eps", "max_fused_bytes", "lane_tile_override"))
def complex_batchnorm2d(x, weight, bias, eps=1e-5,
                        max_fused_bytes=_FUSED_BUDGET_BYTES,
                        lane_tile_override=None):
    """Forward of ComplexBatchNorm2d (training-mode batch statistics).

    x:      (N, 2, C, H, W)
    weight: (2, C)  stacked [real_bn.weight, imag_bn.weight]
    bias:   (2, C)  stacked [real_bn.bias,   imag_bn.bias]
    """
    N, two, C, H, W = x.shape
    assert two == 2, "expected complex input with axis 1 of size 2"
    rows = 2 * C
    hw = H * W
    count = float(N * hw)
    itemsize = jnp.dtype(x.dtype).itemsize

    gamma = weight.reshape(rows, 1).astype(jnp.float32)
    beta = bias.reshape(rows, 1).astype(jnp.float32)

    # ------------------------------------------------ fused VMEM-resident path
    padded_elems = N * _round_up(rows, 8) * _round_up(hw, 128)
    fused_bytes = padded_elems * (2 * itemsize + 8)   # in + out bufs + ~2 f32 temps
    if fused_bytes <= max_fused_bytes:
        xr = x.reshape(N, rows, hw)
        full_spec = pl.BlockSpec((N, rows, hw), lambda i: (0, 0, 0))
        vec_spec = pl.BlockSpec((rows, 1), lambda i: (0, 0))
        out = pl.pallas_call(
            partial(_fused_kernel, inv_count=1.0 / count, eps=eps),
            grid=(1,),
            in_specs=[full_spec, vec_spec, vec_spec],
            out_specs=full_spec,
            out_shape=jax.ShapeDtypeStruct((N, rows, hw), x.dtype),
            compiler_params=pltpu.CompilerParams(
                dimension_semantics=("arbitrary",),
                vmem_limit_bytes=_FUSED_VMEM_LIMIT_BYTES),
        )(xr, gamma, beta)
        return out.reshape(N, 2, C, H, W)

    # ----------------------------------------------- streaming path, hw >= 128
    if hw >= 128:
        xr = x.reshape(N, rows, hw)

        by_budget = max(128, (_MAX_TILE_BYTES // (rows * itemsize)) // 128 * 128)
        lane_tile = min(_MAX_LANE_TILE, by_budget)
        if hw <= lane_tile:
            lane_tile = hw                 # full last dim: allowed even if %128 != 0
        if lane_tile_override is not None:
            lane_tile = lane_tile_override
        num_t = pl.cdiv(hw, lane_tile)
        need_mask = (hw % lane_tile) != 0

        nb_cap = max(1, _TARGET_TILE_BYTES // (rows * lane_tile * itemsize))
        nb = _largest_divisor_leq(N, nb_cap)
        if N % 2 == 0 and N // nb < 2:
            nb = _largest_divisor_leq(N // 2, nb_cap)   # >=2 batch blocks -> shardable
        n_blocks = N // nb
        num_shards = 2 if (n_blocks >= 2 and n_blocks % 2 == 0) else 1
        bps = n_blocks // num_shards

        # pass 1: partial (sum, sum-sq) per shard; "parallel" shard axis lets a
        # v7x megacore use both TCs' DMA paths for the stats read.
        x_stats_spec = pl.BlockSpec((nb, rows, lane_tile),
                                    lambda s, n, t: (s * bps + n, 0, t))
        part_spec = pl.BlockSpec((1, rows, 1), lambda s, n, t: (s, 0, 0))
        psum, pssq = pl.pallas_call(
            partial(_stats3d_kernel, hw=hw, lane_tile=lane_tile, need_mask=need_mask),
            grid=(num_shards, bps, num_t),
            in_specs=[x_stats_spec],
            out_specs=[part_spec, part_spec],
            out_shape=[jax.ShapeDtypeStruct((num_shards, rows, 1), jnp.float32),
                       jax.ShapeDtypeStruct((num_shards, rows, 1), jnp.float32)],
            compiler_params=pltpu.CompilerParams(
                dimension_semantics=("parallel", "arbitrary", "arbitrary"),
                vmem_limit_bytes=_VMEM_LIMIT_BYTES),
        )(xr)

        scale, shift = _finalize_scale_shift(
            jnp.sum(psum, axis=0), jnp.sum(pssq, axis=0), gamma, beta, count, eps)

        # pass 2: streaming y = x*scale + shift, lane-dense, megacore-parallel.
        x_spec = pl.BlockSpec((nb, rows, lane_tile), lambda n, t: (n, 0, t))
        vec_spec = pl.BlockSpec((rows, 1), lambda n, t: (0, 0))
        out = pl.pallas_call(
            _normalize_kernel,
            grid=(n_blocks, num_t),
            in_specs=[vec_spec, vec_spec, x_spec],
            out_specs=x_spec,
            out_shape=jax.ShapeDtypeStruct((N, rows, hw), x.dtype),
            compiler_params=pltpu.CompilerParams(
                dimension_semantics=("parallel", "parallel"),
                vmem_limit_bytes=_VMEM_LIMIT_BYTES),
        )(scale, shift, xr)
        return out.reshape(N, 2, C, H, W)

    # ------------------------------- streaming path, hw < 128 (lane-dense flat)
    # Flatten (2C, H*W) into the lane axis so loads/stores run at full 128-lane
    # density; fold per-lane partials to per-channel stats in tiny plain JAX.
    L = rows * hw
    xr = x.reshape(N, L)

    if N <= 1024:
        nb = N
    else:
        nb = _largest_mult8_divisor_leq(N, 1024) or N
    by_budget = max(128, (_MAX_TILE_BYTES // (nb * itemsize)) // 128 * 128)
    lane_tile = min(_MAX_LANE_TILE, by_budget)
    if L <= lane_tile:
        lane_tile = L
    if lane_tile_override is not None:
        lane_tile = lane_tile_override
    num_t = pl.cdiv(L, lane_tile)
    n_blocks = N // nb

    # pass 1: per-lane partial sums over the batch axis; lane axis is
    # "parallel" (distinct output blocks) so v7x can shard the stats read.
    x_stats_spec = pl.BlockSpec((nb, lane_tile), lambda t, n: (n, t))
    part_spec = pl.BlockSpec((1, lane_tile), lambda t, n: (0, t))
    psum, pssq = pl.pallas_call(
        _stats2d_kernel,
        grid=(num_t, n_blocks),
        in_specs=[x_stats_spec],
        out_specs=[part_spec, part_spec],
        out_shape=[jax.ShapeDtypeStruct((1, L), jnp.float32),
                   jax.ShapeDtypeStruct((1, L), jnp.float32)],
        compiler_params=pltpu.CompilerParams(
            dimension_semantics=("parallel", "arbitrary"),
            vmem_limit_bytes=_VMEM_LIMIT_BYTES),
    )(xr)

    s = psum.reshape(rows, hw).sum(axis=1, keepdims=True)
    ss = pssq.reshape(rows, hw).sum(axis=1, keepdims=True)
    scale, shift = _finalize_scale_shift(s, ss, gamma, beta, count, eps)

    # lane-dense scale/shift maps (tiny: 2C*H*W f32 each)
    scale_l = jnp.broadcast_to(scale, (rows, hw)).reshape(1, L)
    shift_l = jnp.broadcast_to(shift, (rows, hw)).reshape(1, L)

    # pass 2: t outer / n inner so the scale/shift blocks stay resident across
    # the inner batch sweep.
    x_spec = pl.BlockSpec((nb, lane_tile), lambda t, n: (n, t))
    vec_spec = pl.BlockSpec((1, lane_tile), lambda t, n: (0, t))
    out = pl.pallas_call(
        _normalize_kernel,
        grid=(num_t, n_blocks),
        in_specs=[vec_spec, vec_spec, x_spec],
        out_specs=x_spec,
        out_shape=jax.ShapeDtypeStruct((N, L), x.dtype),
        compiler_params=pltpu.CompilerParams(
            dimension_semantics=("parallel", "parallel"),
            vmem_limit_bytes=_VMEM_LIMIT_BYTES),
    )(scale_l, shift_l, xr)
    return out.reshape(N, 2, C, H, W)


# --------------------------------------------------------------------------
# Pure-JAX reference (torch.nn.BatchNorm2d training mode on each complex part)
# --------------------------------------------------------------------------
def _reference(x, weight, bias, eps=1e-5):
    def bn(xp, g, b):  # xp: (N, C, H, W)
        mean = jnp.mean(xp, axis=(0, 2, 3), keepdims=True)
        var = jnp.mean((xp - mean) ** 2, axis=(0, 2, 3), keepdims=True)
        xhat = (xp - mean) / jnp.sqrt(var + eps)
        return xhat * g[None, :, None, None] + b[None, :, None, None]

    real = bn(x[:, 0], weight[0], bias[0])
    imag = bn(x[:, 1], weight[1], bias[1])
    return jnp.stack([real, imag], axis=1)


if __name__ == "__main__":
    key = jax.random.PRNGKey(0)
    kx, kw, kb, kx2, kx3, kx4 = jax.random.split(key, 6)

    # params for C=4 (random instead of torch's ones/zeros to exercise affine)
    w4 = jax.random.normal(kw, (2, 4), dtype=jnp.float32) * 0.5 + 1.0
    b4 = jax.random.normal(kb, (2, 4), dtype=jnp.float32) * 0.1

    # 1) fused VMEM-resident path (small activation)
    x1 = jax.random.normal(kx, (2, 2, 4, 16, 16), dtype=jnp.float32)
    o1 = jax.block_until_ready(complex_batchnorm2d(x1, w4, b4))
    assert o1.shape == x1.shape
    assert jnp.allclose(o1, _reference(x1, w4, b4), atol=1e-4, rtol=1e-4), "fused mismatch"

    # 2) streaming hw>=128 path: masked tail tile + 2-way sharded stats
    x2 = jax.random.normal(kx2, (2, 2, 4, 15, 20), dtype=jnp.float32)   # hw=300
    o2 = jax.block_until_ready(
        complex_batchnorm2d(x2, w4, b4, max_fused_bytes=0, lane_tile_override=128))
    assert jnp.allclose(o2, _reference(x2, w4, b4), atol=1e-4, rtol=1e-4), "stream-A mismatch"

    # 3) streaming hw>=128 path with auto tile pick (full-hw lane tile)
    x3 = jax.random.normal(kx3, (2, 2, 4, 56, 56), dtype=jnp.float32)   # hw=3136
    o3 = jax.block_until_ready(complex_batchnorm2d(x3, w4, b4, max_fused_bytes=0))
    assert jnp.allclose(o3, _reference(x3, w4, b4), atol=1e-3, rtol=1e-3), "stream-A auto mismatch"

    # 4) streaming lane-dense flat path (hw < 128, like the 7x6 / 14x14 stages)
    w8 = jax.random.normal(kw, (2, 8), dtype=jnp.float32) * 0.5 + 1.0
    b8 = jax.random.normal(kb, (2, 8), dtype=jnp.float32) * 0.1
    x4 = jax.random.normal(kx4, (4, 2, 8, 7, 6), dtype=jnp.float32)     # hw=42
    o4 = jax.block_until_ready(
        complex_batchnorm2d(x4, w8, b8, max_fused_bytes=0, lane_tile_override=128))
    assert jnp.allclose(o4, _reference(x4, w8, b8), atol=1e-4, rtol=1e-4), "stream-B mismatch"

    # 5) bf16 activations through the fused path (compute f32, store bf16)
    x5 = x1.astype(jnp.bfloat16)
    o5 = jax.block_until_ready(complex_batchnorm2d(x5, w4, b4))
    ref5 = _reference(x5.astype(jnp.float32), w4, b4)
    assert o5.dtype == jnp.bfloat16
    assert jnp.allclose(o5.astype(jnp.float32), ref5, atol=5e-2, rtol=5e-2), "bf16 mismatch"

    print("KERNEL_OK")
</pallas_src>

<mosaic_0001>
module attributes {stable_mosaic.version = 11 : i64} {
  func.func @_fused_kernel(%arg0: i32, %arg1: memref<2x8x256xf32, #tpu.memory_space<vmem>>, %arg2: memref<8x1xf32, #tpu.memory_space<vmem>>, %arg3: memref<8x1xf32, #tpu.memory_space<vmem>>, %arg4: memref<2x8x256xf32, #tpu.memory_space<vmem>>) attributes {dimension_semantics = [#tpu.dimension_semantics<arbitrary>], iteration_bounds = array<i64: 1>, scalar_prefetch = 0 : i64, scratch_operands = 0 : i64, tpu.core_type = #tpu.core_type<tc>, window_params = [{pipeline_mode = #tpu.pipeline_mode<synchronous>, transform_indices = @transform_0, window_bounds = array<i64: 2, 8, 256>}, {pipeline_mode = #tpu.pipeline_mode<synchronous>, transform_indices = @transform_1, window_bounds = array<i64: 8, 1>}, {pipeline_mode = #tpu.pipeline_mode<synchronous>, transform_indices = @transform_2, window_bounds = array<i64: 8, 1>}, {pipeline_mode = #tpu.pipeline_mode<synchronous>, transform_indices = @transform_3, window_bounds = array<i64: 2, 8, 256>}]} {
    %c0 = arith.constant 0 : index
    %c0_0 = arith.constant 0 : index
    %c0_1 = arith.constant 0 : index
    %0 = vector.load %arg1[%c0, %c0_0, %c0_1] : memref<2x8x256xf32, #tpu.memory_space<vmem>>, vector<2x8x256xf32>
    %cst = arith.constant dense<0.000000e+00> : vector<8x256xf32>
    %1 = vector.multi_reduction <add>, %0, %cst [0] : vector<2x8x256xf32> to vector<8x256xf32>
    %cst_2 = arith.constant dense<0.000000e+00> : vector<8xf32>
    %2 = vector.multi_reduction <add>, %1, %cst_2 [1] : vector<8x256xf32> to vector<8xf32>
    %3 = vector.shape_cast %2 : vector<8xf32> to vector<8x1xf32>
    %4 = arith.mulf %0, %0 : vector<2x8x256xf32>
    %cst_3 = arith.constant dense<0.000000e+00> : vector<8x256xf32>
    %5 = vector.multi_reduction <add>, %4, %cst_3 [0] : vector<2x8x256xf32> to vector<8x256xf32>
    %cst_4 = arith.constant dense<0.000000e+00> : vector<8xf32>
    %6 = vector.multi_reduction <add>, %5, %cst_4 [1] : vector<8x256xf32> to vector<8xf32>
    %7 = vector.shape_cast %6 : vector<8xf32> to vector<8x1xf32>
    %cst_5 = arith.constant 0.001953125 : f32
    %8 = vector.broadcast %cst_5 : f32 to vector<8x1xf32>
    %9 = arith.mulf %3, %8 : vector<8x1xf32>
    %cst_6 = arith.constant 0.001953125 : f32
    %10 = vector.broadcast %cst_6 : f32 to vector<8x1xf32>
    %11 = arith.mulf %7, %10 : vector<8x1xf32>
    %12 = arith.mulf %9, %9 : vector<8x1xf32>
    %13 = arith.subf %11, %12 : vector<8x1xf32>
    %cst_7 = arith.constant 0.000000e+00 : f32
    %14 = vector.broadcast %cst_7 : f32 to vector<8x1xf32>
    %15 = arith.maximumf %13, %14 : vector<8x1xf32>
    %c0_8 = arith.constant 0 : index
    %c0_9 = arith.constant 0 : index
    %16 = vector.load %arg2[%c0_8, %c0_9] : memref<8x1xf32, #tpu.memory_space<vmem>>, vector<8x1xf32>
    %cst_10 = arith.constant 9.99999974E-6 : f32
    %17 = vector.broadcast %cst_10 : f32 to vector<8x1xf32>
    %18 = arith.addf %15, %17 : vector<8x1xf32>
    %19 = math.rsqrt %18 : vector<8x1xf32>
    %20 = arith.mulf %16, %19 : vector<8x1xf32>
    %c0_11 = arith.constant 0 : index
    %c0_12 = arith.constant 0 : index
    %21 = vector.load %arg3[%c0_11, %c0_12] : memref<8x1xf32, #tpu.memory_space<vmem>>, vector<8x1xf32>
    %22 = arith.mulf %9, %20 : vector<8x1xf32>
    %23 = arith.subf %21, %22 : vector<8x1xf32>
    %24 = vector.shape_cast %20 : vector<8x1xf32> to vector<1x8x1xf32>
    %25 = vector.broadcast %24 : vector<1x8x1xf32> to vector<2x8x256xf32>
    %26 = arith.mulf %0, %25 : vector<2x8x256xf32>
    %27 = vector.shape_cast %23 : vector<8x1xf32> to vector<1x8x1xf32>
    %28 = vector.broadcast %27 : vector<1x8x1xf32> to vector<2x8x256xf32>
    %29 = arith.addf %26, %28 : vector<2x8x256xf32>
    %c0_13 = arith.constant 0 : index
    %c0_14 = arith.constant 0 : index
    %c0_15 = arith.constant 0 : index
    %30 = vector.load %arg4[%c0_13, %c0_14, %c0_15] : memref<2x8x256xf32, #tpu.memory_space<vmem>>, vector<2x8x256xf32>
    tpu.vector_store %arg4[%c0_13, %c0_14, %c0_15], %29 {strides = array<i32>} : memref<2x8x256xf32, #tpu.memory_space<vmem>>, vector<2x8x256xf32>,
    return
  }
  func.func @transform_0(%arg0: i32) -> (i32, i32, i32) {
    %c0_i32 = arith.constant 0 : i32
    %c0_i32_0 = arith.constant 0 : i32
    %c0_i32_1 = arith.constant 0 : i32
    %c0_i32_2 = arith.constant 0 : i32
    return %c0_i32, %c0_i32_0, %c0_i32_1 : i32, i32, i32
  }
  func.func @transform_1(%arg0: i32) -> (i32, i32) {
    %c0_i32 = arith.constant 0 : i32
    %c0_i32_0 = arith.constant 0 : i32
    %c0_i32_1 = arith.constant 0 : i32
    return %c0_i32, %c0_i32_0 : i32, i32
  }
  func.func @transform_2(%arg0: i32) -> (i32, i32) {
    %c0_i32 = arith.constant 0 : i32
    %c0_i32_0 = arith.constant 0 : i32
    %c0_i32_1 = arith.constant 0 : i32
    return %c0_i32, %c0_i32_0 : i32, i32
  }
  func.func @transform_3(%arg0: i32) -> (i32, i32, i32) {
    %c0_i32 = arith.constant 0 : i32
    %c0_i32_0 = arith.constant 0 : i32
    %c0_i32_1 = arith.constant 0 : i32
    %c0_i32_2 = arith.constant 0 : i32
    return %c0_i32, %c0_i32_0, %c0_i32_1 : i32, i32, i32
  }
}

</mosaic_0001>

<bundles_post_ra>
// kernel: complex_batchnorm2d.1
= control target key start
LH: loop header
LB: loop body
LE: loop exit
PB: predicated region body
PF: predicated region fallthrough
CT: control target
= control target key end

     0   :  { %v84_v14 = vmov 0   ;;  %s135_s0 = inlined_call_operand.vmem [shape: f32[2,8,256], index: 0, kind: input, shape index: {}]   ;;  %s136_s1 = inlined_call_operand.vmem [shape: f32[8,1], index: 1, kind: input, shape index: {}]   ;;  %s137_s2 = inlined_call_operand.vmem [shape: f32[8,1], index: 2, kind: input, shape index: {}]   ;;  %s138_s3 = inlined_call_operand.vmem [shape: f32[2,8,256], index: 3, kind: output, shape index: {}]  }
   0x1   :  { %v14_v0 = vld [vmem:[%s135_s0] sm:$0xff]  ;;  %v15_v1 = vld [vmem:[%s135_s0 + $0x8] sm:$0xff]  ;;  %v16_v2 = vld [vmem:[%s135_s0 + $0x10] sm:$0xff]  ;;  %80 = vset.pattern.permute.xlu1 %v84_v14  ;;  %81 = vset.pattern.permute.xlu0 %v84_v14 }
   0x2   :  { %v17_v3 = vld [vmem:[%s135_s0 + $0x18] sm:$0xff]  ;;  %v18_v4 = vadd.f32 %v16_v2, %v14_v0  ;;  %v23_v5 = vmul.f32 %v14_v0, %v14_v0  ;;  %v24_v7 = vmul.f32 %v15_v1, %v15_v1  ;;  %v25_v8 = vmul.f32 %v16_v2, %v16_v2  ;;  %v37_v28 = vld [vmem:[%s136_s1] sm:$0xff] }
   0x3   :  { %v19_v6 = vadd.f32 %v17_v3, %v15_v1  ;;  %v26_v9 = vmul.f32 %v17_v3, %v17_v3  ;;  %v50_v33 = vld [vmem:[%s137_s2] sm:$0xff] }
   0x4   :  { %v27_v11 = vadd.f32 %v25_v8, %v23_v5 }
   0x5   :  { %v20_v10 = vadd.f32 %v19_v6, %v18_v4  ;;  %v28_v12 = vadd.f32 %v26_v9, %v24_v7 }
   0x7   :  { %21 = vadd.xlane.f32.xlu0 %v20_v10  ;;  %v29_v13 = vadd.f32 %v28_v12, %v27_v11 }
   0xf   :  { %30 = vadd.xlane.f32.xlu0 %v29_v13 }
  0x7a   :  { %v22_v15 = vpop.xlane.xlu0 %21 }
  0x7b   :  { %v32_v16 = vmul.f32 0.001953125, %v22_v15 }
  0x7d   :  { %v34_v18 = vmul.f32 %v32_v16, %v32_v16 }
  0x82   :  { %v31_v17 = vpop.xlane.xlu0 %30 }
  0x83   :  { %v33_v19 = vmul.f32 0.001953125, %v31_v17 }
  0x85   :  { %v35_v20 = vsub.f32 %v33_v19, %v34_v18 }
  0x87   :  { %v36_v21 = vmax.f32 %v35_v20, 0.0 }
  0x89   :  { %v38_v22 = vadd.f32 1e-05, %v36_v21 }
  0x8b   :  { %82 = vrsqrt.f32 %v38_v22  ;;  %vm45_vm1 = vweird.f32 %v38_v22 }
  0x91   :  { %v83_v23 = vpop.eup %82 }
  0x92   :  { %v40_v24 = vmul.f32 %v83_v23, %v38_v22  ;;  %vm46_vm0 = vweird.f32 %v83_v23 }
  0x93   :  { %vm47_vm2 = vmor %vm45_vm1, %vm46_vm0 }
  0x94   :  { %v41_v25 = vmul.f32 %v83_v23, %v40_v24 }
  0x96   :  { %v42_v26 = vmul.f32 0.5, %v41_v25 }
  0x98   :  { %v43_v27 = vsub.f32 1.5, %v42_v26 }
  0x9a   :  { %v44_v29 = vmul.f32 %v83_v23, %v43_v27 }
  0x9c   :  { %v48_v30 = vsel %vm47_vm2, %v83_v23, %v44_v29 }
  0x9d   :  { %v49_v31 = vmul.f32 %v48_v30, %v37_v28 }
  0x9f   :  { %55 = vperm.xlu1 %80, %v49_v31   ;;  %v51_v32 = vmul.f32 %v49_v31, %v32_v16 }
  0xa1   :  { %v52_v34 = vsub.f32 %v50_v33, %v51_v32 }
  0xa7   :  { %64 = vperm.xlu1 %80, %v52_v34  }
 0x111   :  { %v56_v35 = vpop.permute.xlu1 %55 }
 0x112   :  { %v58_v36 = vmul.f32 %v56_v35, %v14_v0  ;;  %v59_v37 = vmul.f32 %v56_v35, %v15_v1  ;;  %v60_v38 = vmul.f32 %v56_v35, %v16_v2  ;;  %v61_v39 = vmul.f32 %v56_v35, %v17_v3 }
 0x119   :  { %v65_v40 = vpop.permute.xlu1 %64 }
 0x11a   :  { %v67_v41 = vadd.f32 %v65_v40, %v58_v36  ;;  %v68_v42 = vadd.f32 %v65_v40, %v59_v37  ;;  %v69_v43 = vadd.f32 %v65_v40, %v60_v38  ;;  %v70_v44 = vadd.f32 %v65_v40, %v61_v39 }
 0x11c   :  { %71 = vst [vmem:[%s138_s3] sm:$0xff] %v67_v41 }
 0x11d   :  { %72 = vst [vmem:[%s138_s3 + $0x8] sm:$0xff] %v68_v42 }
 0x11e   :  { %73 = vst [vmem:[%s138_s3 + $0x10] sm:$0xff] %v69_v43 }
 0x11f   :  { %74 = vst [vmem:[%s138_s3 + $0x18] sm:$0xff] %v70_v44 }

</bundles_post_ra>
